<compile_context>
chip_gen: v7x
topology: tpu7x:2x2x1
jax: 0.10.0
libtpu: 0.0.40
codegen_flags: <defaults>
</compile_context>

<pallas_src>
import jax
import jax.numpy as jnp
from jax.experimental import pallas as pl
from jax.experimental.pallas import tpu as pltpu

_MIB = 1024 * 1024


def _attention_pooling_kernel(x_ref, w1_ref, b1_ref, w2_ref, o_ref):
    bblk, n, d = x_ref.shape
    hdim = w1_ref.shape[1]

    x = x_ref[...]                                    # (Bblk, N, D), native dtype

    # ---- First linear + tanh on the MXU -----------------------------------
    # Flatten (Bblk, N) rows first (free relayout for f32 when N % 8 == 0),
    # then cast to the MXU input dtype (bf16) with f32 accumulation.
    x2 = x.reshape(bblk * n, d).astype(w1_ref.dtype)  # (Bblk*N, D)
    h = jnp.tanh(
        jnp.dot(x2, w1_ref[...], preferred_element_type=jnp.float32)
        + b1_ref[...].astype(jnp.float32)
    )                                                 # (Bblk*N, H) f32

    # ---- Second linear (H -> 1): VPU multiply + lane reduction ------------
    # b2 is omitted: softmax(scores + b2) == softmax(scores).
    s = jnp.sum(
        h.reshape(bblk, n, hdim) * w2_ref[...].astype(jnp.float32), axis=-1
    )                                                 # (Bblk, N) f32

    # ---- Softmax over N (lanes) --------------------------------------------
    m = jnp.max(s, axis=-1, keepdims=True)
    e = jnp.exp(s - m)
    w = e * pl.reciprocal(jnp.sum(e, axis=-1, keepdims=True), approx=True)

    # ---- Weighted pooling: VPU multiply + sublane (XLU) reduction, f32 ------
    pooled = jnp.sum(w[:, :, None] * x.astype(jnp.float32), axis=1)  # (Bblk, D)
    o_ref[...] = pooled.astype(o_ref.dtype)


def _vmem_limit_bytes():
    """Generation-aware scoped-VMEM limit.

    v5e/v6e (128 MiB physical) -> 64 MiB scoped; v7x (64 MiB physical per
    TensorCore) -> 48 MiB scoped.  Falls back to the v7x-safe value if the
    hardware query is unavailable.
    """
    phys = None
    try:
        phys = getattr(pltpu.get_tpu_info(), "vmem_capacity_bytes", None)
    except Exception:
        phys = None
    if not phys:
        phys = 64 * _MIB
    return int(min(phys * 3 // 4, 64 * _MIB))


def _choose_block_b(B, N, D, H, x_itemsize, block_budget_bytes):
    """Batch elements per grid step, bounded by the in-kernel working set.

    Per batch element the kernel holds approximately (bytes):
      2 * N*D*itemsize   double-buffered x input block
      2 * N*D            bf16 copy fed to the MXU
      4 * N*H            f32 hidden activations (tanh output)
      4 * N*D            f32 product in the weighted pooling
      ~8*D + 16*N        pooled row / scores / softmax temporaries (tiny)
    """
    per_b = (2 * N * D * x_itemsize) + 2 * N * D + 4 * N * H + 4 * N * D + 8 * D + 16 * N
    cap = max(1, block_budget_bytes // max(1, per_b))
    if cap >= B:
        return B                      # single full block (always a legal shape)
    if cap >= 8:
        return (cap // 8) * 8         # keep partial blocks sublane-dense
    return cap                        # tiny budget: never exceed the VMEM cap


def _maybe_split_for_cores(B, block_b):
    """On multi-TensorCore parts (v7x) ensure >= 2 grid steps when B allows,
    so the 'parallel' batch axis actually shards across both cores."""
    try:
        kind = jax.devices()[0].device_kind.lower()
    except Exception:
        return block_b
    multi_core = ("v7" in kind) or ("7x" in kind)
    if multi_core and block_b >= B and B >= 16:
        half = (B + 1) // 2
        return min(B, ((half + 7) // 8) * 8)
    return block_b


def attention_pooling(x, w1, b1, w2, b2, *, block_b=None, mxu_dtype=jnp.bfloat16):
    """x: (B, N, D); w1: (D, H); b1: (H,); w2: (H, 1); b2: (1,). Returns (B, D)."""
    del b2  # softmax is shift-invariant: the "+ b2" on the scores cancels exactly.
    B, N, D = x.shape
    H = w1.shape[1]

    vmem_limit = _vmem_limit_bytes()
    if block_b is None:
        block_b = _choose_block_b(B, N, D, H, x.dtype.itemsize, vmem_limit // 2)
        block_b = _maybe_split_for_cores(B, block_b)
    block_b = max(1, min(int(block_b), B))
    grid_b = pl.cdiv(B, block_b)      # no jnp.pad: ragged edge block is clipped

    # MXU-friendly weight layout (bf16 inputs, f32 accumulation in-kernel).
    w1_m = w1.astype(mxu_dtype)
    b1_2d = b1.reshape(1, H).astype(jnp.float32)
    w2_row = w2.reshape(1, H).astype(jnp.float32)   # (H, 1) -> row for lane reduce

    # NOTE: the weight BlockSpecs have constant index_maps; their VMEM cost is
    # tiny here, so we keep default buffering (pl.Buffered(1) is an option for
    # very large D*H on v7x).
    out = pl.pallas_call(
        _attention_pooling_kernel,
        out_shape=jax.ShapeDtypeStruct((B, D), x.dtype),
        grid_spec=pltpu.PrefetchScalarGridSpec(
            num_scalar_prefetch=0,
            grid=(grid_b,),
            in_specs=[
                pl.BlockSpec((block_b, N, D), lambda i: (i, 0, 0)),  # x slab
                pl.BlockSpec((D, H), lambda i: (0, 0)),              # W1 (bf16)
                pl.BlockSpec((1, H), lambda i: (0, 0)),              # b1
                pl.BlockSpec((1, H), lambda i: (0, 0)),              # W2 (as row)
            ],
            out_specs=pl.BlockSpec((block_b, D), lambda i: (i, 0)),
        ),
        compiler_params=pltpu.CompilerParams(
            dimension_semantics=("parallel",),
            vmem_limit_bytes=vmem_limit,
        ),
    )(x, w1_m, b1_2d, w2_row)
    return out


def attention_pooling_ref(x, w1, b1, w2, b2):
    """Pure-JAX reference mirroring the PyTorch forward."""
    scores = jnp.tanh(x @ w1 + b1) @ w2 + b2               # (B, N, 1)
    weights = jax.nn.softmax(scores, axis=1)               # softmax over N
    return jnp.sum(weights * x, axis=1)                    # (B, D)


if __name__ == "__main__":
    # Small, forward-consistent shapes: batch=2, nodes=8, in_dim=32, hidden=128.
    B, N, D, H = 2, 8, 32, 128

    key = jax.random.PRNGKey(0)
    kx, kw1, kb1, kw2, kb2 = jax.random.split(key, 5)

    x = jax.random.normal(kx, (B, N, D), dtype=jnp.float32)

    # Deterministic synthetic parameters (PyTorch-Linear-like uniform init).
    lim1 = 1.0 / jnp.sqrt(D)
    w1 = jax.random.uniform(kw1, (D, H), jnp.float32, -lim1, lim1)
    b1 = jax.random.uniform(kb1, (H,), jnp.float32, -lim1, lim1)
    lim2 = 1.0 / jnp.sqrt(H)
    w2 = jax.random.uniform(kw2, (H, 1), jnp.float32, -lim2, lim2)
    b2 = jax.random.uniform(kb2, (1,), jnp.float32, -lim2, lim2)

    out = attention_pooling(x, w1, b1, w2, b2)
    out = jax.block_until_ready(out)

    ref = attention_pooling_ref(x, w1, b1, w2, b2)
    assert out.shape == (B, D)
    # Tolerance accounts for bf16 MXU inputs on the first linear and the
    # approx (EUP) softmax reciprocal; pooling itself is exact f32.
    assert jnp.allclose(out, ref, atol=2e-2, rtol=2e-2), "mismatch vs reference"

    print("KERNEL_OK")
</pallas_src>

<mosaic_0001>
module attributes {stable_mosaic.version = 11 : i64} {
  func.func @_attention_pooling_kernel(%arg0: i32, %arg1: memref<2x8x32xf32, #tpu.memory_space<vmem>>, %arg2: memref<32x128xbf16, #tpu.memory_space<vmem>>, %arg3: memref<1x128xf32, #tpu.memory_space<vmem>>, %arg4: memref<1x128xf32, #tpu.memory_space<vmem>>, %arg5: memref<2x32xf32, #tpu.memory_space<vmem>>) attributes {dimension_semantics = [#tpu.dimension_semantics<parallel>], iteration_bounds = array<i64: 1>, scalar_prefetch = 0 : i64, scratch_operands = 0 : i64, tpu.core_type = #tpu.core_type<tc>, window_params = [{transform_indices = @transform_0, window_bounds = array<i64: 2, 8, 32>}, {pipeline_mode = #tpu.pipeline_mode<synchronous>, transform_indices = @transform_1, window_bounds = array<i64: 32, 128>}, {pipeline_mode = #tpu.pipeline_mode<synchronous>, transform_indices = @transform_2, window_bounds = array<i64: 1, 128>}, {pipeline_mode = #tpu.pipeline_mode<synchronous>, transform_indices = @transform_3, window_bounds = array<i64: 1, 128>}, {transform_indices = @transform_4, window_bounds = array<i64: 2, 32>}]} {
    %c0 = arith.constant 0 : index
    %c0_0 = arith.constant 0 : index
    %c0_1 = arith.constant 0 : index
    %0 = vector.load %arg1[%c0, %c0_0, %c0_1] : memref<2x8x32xf32, #tpu.memory_space<vmem>>, vector<2x8x32xf32>
    %1 = vector.shape_cast %0 : vector<2x8x32xf32> to vector<16x32xf32>
    %2 = arith.truncf %1 : vector<16x32xf32> to vector<16x32xbf16>
    %c0_2 = arith.constant 0 : index
    %c0_3 = arith.constant 0 : index
    %3 = vector.load %arg2[%c0_2, %c0_3] : memref<32x128xbf16, #tpu.memory_space<vmem>>, vector<32x128xbf16>
    %cst = arith.constant dense<0.000000e+00> : vector<16x128xf32>
    %4 = tpu.matmul %2, %3, %cst {dimension_numbers = #tpu.dot_dimension_numbers<[1], [0], [0], [1], [0, 0, 1, 1], [], []>} : vector<16x32xbf16>, vector<32x128xbf16>, vector<16x128xf32> -> vector<16x128xf32>
    %c0_4 = arith.constant 0 : index
    %c0_5 = arith.constant 0 : index
    %5 = vector.load %arg3[%c0_4, %c0_5] : memref<1x128xf32, #tpu.memory_space<vmem>>, vector<1x128xf32>
    %6 = vector.broadcast %5 : vector<1x128xf32> to vector<16x128xf32>
    %7 = arith.addf %4, %6 : vector<16x128xf32>
    %8 = math.tanh %7 : vector<16x128xf32>
    %9 = vector.shape_cast %8 : vector<16x128xf32> to vector<2x8x128xf32>
    %c0_6 = arith.constant 0 : index
    %c0_7 = arith.constant 0 : index
    %10 = vector.load %arg4[%c0_6, %c0_7] : memref<1x128xf32, #tpu.memory_space<vmem>>, vector<1x128xf32>
    %11 = vector.shape_cast %10 : vector<1x128xf32> to vector<1x1x128xf32>
    %12 = vector.broadcast %11 : vector<1x1x128xf32> to vector<2x8x128xf32>
    %13 = arith.mulf %9, %12 : vector<2x8x128xf32>
    %cst_8 = arith.constant dense<0.000000e+00> : vector<2x8xf32>
    %14 = vector.multi_reduction <add>, %13, %cst_8 [2] : vector<2x8x128xf32> to vector<2x8xf32>
    %cst_9 = arith.constant dense<0xFF800000> : vector<2xf32>
    %15 = vector.multi_reduction <maximumf>, %14, %cst_9 [1] : vector<2x8xf32> to vector<2xf32>
    %16 = vector.shape_cast %15 : vector<2xf32> to vector<2x1xf32>
    %17 = vector.broadcast %16 : vector<2x1xf32> to vector<2x8xf32>
    %18 = arith.subf %14, %17 : vector<2x8xf32>
    %19 = math.exp %18 : vector<2x8xf32>
    %cst_10 = arith.constant dense<0.000000e+00> : vector<2xf32>
    %20 = vector.multi_reduction <add>, %19, %cst_10 [1] : vector<2x8xf32> to vector<2xf32>
    %21 = vector.shape_cast %20 : vector<2xf32> to vector<2x1xf32>
    %22 = tpu.reciprocal %21 {approx = true} : vector<2x1xf32> -> vector<2x1xf32>
    %23 = vector.broadcast %22 : vector<2x1xf32> to vector<2x8xf32>
    %24 = arith.mulf %19, %23 : vector<2x8xf32>
    %25 = vector.shape_cast %24 : vector<2x8xf32> to vector<2x8x1xf32>
    %26 = vector.broadcast %25 : vector<2x8x1xf32> to vector<2x8x32xf32>
    %27 = arith.mulf %26, %0 : vector<2x8x32xf32>
    %cst_11 = arith.constant dense<0.000000e+00> : vector<2x32xf32>
    %28 = vector.multi_reduction <add>, %27, %cst_11 [1] : vector<2x8x32xf32> to vector<2x32xf32>
    %c0_12 = arith.constant 0 : index
    %c0_13 = arith.constant 0 : index
    %29 = vector.load %arg5[%c0_12, %c0_13] : memref<2x32xf32, #tpu.memory_space<vmem>>, vector<2x32xf32>
    tpu.vector_store %arg5[%c0_12, %c0_13], %28 {strides = array<i32>} : memref<2x32xf32, #tpu.memory_space<vmem>>, vector<2x32xf32>,
    return
  }
  func.func @transform_0(%arg0: i32) -> (i32, i32, i32) {
    %c0_i32 = arith.constant 0 : i32
    %c0_i32_0 = arith.constant 0 : i32
    %c0_i32_1 = arith.constant 0 : i32
    return %arg0, %c0_i32, %c0_i32_0 : i32, i32, i32
  }
  func.func @transform_1(%arg0: i32) -> (i32, i32) {
    %c0_i32 = arith.constant 0 : i32
    %c0_i32_0 = arith.constant 0 : i32
    %c0_i32_1 = arith.constant 0 : i32
    return %c0_i32, %c0_i32_0 : i32, i32
  }
  func.func @transform_2(%arg0: i32) -> (i32, i32) {
    %c0_i32 = arith.constant 0 : i32
    %c0_i32_0 = arith.constant 0 : i32
    %c0_i32_1 = arith.constant 0 : i32
    return %c0_i32, %c0_i32_0 : i32, i32
  }
  func.func @transform_3(%arg0: i32) -> (i32, i32) {
    %c0_i32 = arith.constant 0 : i32
    %c0_i32_0 = arith.constant 0 : i32
    %c0_i32_1 = arith.constant 0 : i32
    return %c0_i32, %c0_i32_0 : i32, i32
  }
  func.func @transform_4(%arg0: i32) -> (i32, i32) {
    %c0_i32 = arith.constant 0 : i32
    %c0_i32_0 = arith.constant 0 : i32
    return %arg0, %c0_i32 : i32, i32
  }
}

</mosaic_0001>

<bundles_post_ra>
// kernel: tpu_custom_call.1
= control target key start
LH: loop header
LB: loop body
LE: loop exit
PB: predicated region body
PF: predicated region fallthrough
CT: control target
= control target key end

     0   :  { %9 = vsyncpa [#allocation3], 0  ;;  %s457_s0 = inlined_call_operand.hbm [shape: f32[2,8,32], index: 0, kind: input, shape index: {}]   ;;  %s458_s1 = inlined_call_operand.hbm [shape: bf16[32,128], index: 1, kind: input, shape index: {}]   ;;  %s459_s2 = inlined_call_operand.vmem [shape: f32[1,128], index: 2, kind: input, shape index: {}]   ;;  %s460_s3 = inlined_call_operand.vmem [shape: f32[1,128], index: 3, kind: input, shape index: {}]   ;;  %s461_s4 = inlined_call_operand.hbm [shape: f32[2,32], index: 4, kind: output, shape index: {}]  }
   0x1   :  { %10 = vsyncpa [#allocation6], 0 }
   0x2   :  { %11 = vsyncpa [#allocation4], 0  ;;  %s364_s15 = smov [#allocation2]   ;;  %s292_s19 = scalar_lea.hbm %s457_s0, 256 }
   0x3   :  { %s17_s16 = sshll.u32 %s364_s15, 4  ;;  %p293_p0 = scmp.ne.s32.totalorder %s457_s0, %s292_s19  ;;  %s18_s16 = int_to_ptr.vmem [resolvable:$true] %s17_s16 }
   0x4   :  { %p296_p1 = scmp.lt.u32.totalorder %s292_s19, %s457_s0 }
   0x6   :  { %p298_p2 = pnand %p296_p1, %p293_p0 }
   0x8   :  { %301 = shalt.err (!%p298_p2)
}
   0x9   :  { %s302_s24 = scalar_lea.vmem %s18_s16, 256  ;;  %p307_p4 = scmp.lt.s32.totalorder %s18_s16, %s18_s16 }
   0xa   :  { %p303_p3 = scmp.ne.s32.totalorder %s18_s16, %s302_s24  ;;  %p308_p5 = scmp.lt.s32.totalorder %s302_s24, %s302_s24 }
   0xc   :  { %p309_p6 = por %p308_p5, %p307_p4 }
   0xe   :  { %p310_p7 = pnand %p309_p6, %p303_p3 }
  0x10   :  { %313 = shalt.err (!%p310_p7)
}
  0x11   :  { %s365_s25 = smov 128   ;;  %s366_s26 = smov 8  }
  0x12   :  { %23 = dma.hbm_to_vmem [thread:$0]  %s457_s0, 256, %s18_s16, [#allocation3], %s365_s25, %s365_s25, %s366_s26  }
  0x13   :  { %s367_s29 = smov [#allocation5]   ;;  %s314_s7 = scalar_lea.hbm %s458_s1, 256 }
  0x14   :  { %s29_s30 = sshll.u32 %s367_s29, 4  ;;  %p315_p8 = scmp.ne.s32.totalorder %s458_s1, %s314_s7  ;;  %s30_s30 = int_to_ptr.vmem [resolvable:$true] %s29_s30 }
  0x15   :  { %p318_p9 = scmp.lt.u32.totalorder %s314_s7, %s458_s1 }
  0x17   :  { %p320_p10 = pnand %p318_p9, %p315_p8 }
  0x19   :  { %323 = shalt.err (!%p320_p10)
}
  0x1a   :  { %s324_s12 = scalar_lea.vmem %s30_s30, 256  ;;  %p329_p12 = scmp.lt.s32.totalorder %s30_s30, %s30_s30 }
  0x1b   :  { %p325_p11 = scmp.ne.s32.totalorder %s30_s30, %s324_s12  ;;  %p330_p13 = scmp.lt.s32.totalorder %s324_s12, %s324_s12 }
  0x1d   :  { %p331_p0 = por %p330_p13, %p329_p12 }
  0x1f   :  { %p332_p1 = pnand %p331_p0, %p325_p11 }
  0x21   :  { %335 = shalt.err (!%p332_p1)
}
  0x22   :  { %s368_s0 = smov 64   ;;  %s369_s13 = smov 4  }
  0x23   :  { %35 = dma.hbm_to_vmem [thread:$0]  %s458_s1, 256, %s30_s30, [#allocation6], %s368_s0, %s368_s0, %s369_s13  }
  0x24   :  { %358 = dma.done.wait [#allocation3], 256  }
  0x25   :  { %359 = vsyncadd [#allocation3], 4294967040 }
  0x26   :  { %360 = dma.done.wait [#allocation6], 256  }
  0x27   :  { %361 = vsyncadd [#allocation6], 4294967040  ;;  %v370_v0 = vmov 0.0   ;;  %vm371_vm0 = vmmov 0   ;;  %v280_v1 = vld [vmem:[#allocation5] sm:$0xff]   ;;  %v281_v2 = vld [vmem:[#allocation5 + $0x8] sm:$0xff]   ;;  %v135_v18 = vlaneseq }
  0x28   :  { %260 = vmatprep.subr.bf16.mxu0 %v370_v0  ;;  %264 = vmatprep.mubr.msk.bf16.mxu0 %vm371_vm0, %v370_v0  ;;  %v423_v3 = vld [vmem:[#allocation2] sm:$0xff]  ;;  %v425_v4 = vld [vmem:[#allocation2 + $0x8] sm:$0xff]  ;;  %vm73_vm1 = vcmask 261120   ;;  %vm145_vm2 = vcmask 1041409   ;;  %vm148_vm3 = vcmask 58368   ;;  %v372_v28 = vmov 0  }
  0x29   :  { %261 = vmatpush3.bf16.msra.mxu0 %v280_v1  ;;  %v49_v5 = vpack.c.bf16 %v425_v4, %v423_v3  ;;  %v252_v6 = vld [vmem:[%s459_s2] ss:$0 sm:$0xff]  ;;  %v136_v19 = vand.u32 127, %v135_v18  ;;  %v138_v20 = vshrl.u32 %v135_v18, 7  ;;  %279 = vset.pattern.permute.xlu0 %v372_v28  ;;  %s373_s2 = smov [#allocation7]   ;;  %vm234_vm4 = vcmask 254976  }
  0x2a   :  { %262 = vmatprep.subr.bf16.mxu0 %v370_v0  ;;  %v256_v13 = vld [vmem:[%s460_s3] ss:$0 sm:$0xff]  ;;  %278 = vset.pattern.permute.xlu1 %v372_v28  ;;  %s242_s3 = sshll.u32 %s373_s2, 4  ;;  %s243_s3 = int_to_ptr.vmem [resolvable:$true] %s242_s3 }
  0x2b   :  { %v139_v22 = vsub.s32 %v136_v19, %v138_v20  ;;  %v155_v29 = vsub.s32 0, %v138_v20  ;;  %v159_v30 = vsub.s32 1, %v138_v20  ;;  %s336_s19 = scalar_lea.vmem %s243_s3, 32  ;;  %p341_p3 = scmp.lt.s32.totalorder %s243_s3, %s243_s3 }
  0x2c   :  { %p337_p2 = scmp.ne.s32.totalorder %s243_s3, %s336_s19  ;;  %p342_p4 = scmp.lt.s32.totalorder %s336_s19, %s336_s19 }
  0x2d   :  { %263 = vmatpush3.bf16.msra.mxu0 %v281_v2 }
  0x2e   :  { %p343_p5 = por %p342_p4, %p341_p3 }
  0x30   :  { %265 = vmatmul.mubr.msk.bf16.vlgmr.msra.gmra.mrb[0].mxu0 %vm73_vm1, %v49_v5  ;;  %p344_p6 = pnand %p343_p5, %p337_p2 }
 0x103   :  { %v111_v7 = vpop.f32.mrb[0].mxu0 }
 0x104   :  { %v112_v8 = vadd.f32 %v252_v6, %v111_v7  ;;  %v266_v9 = vpop.f32.mrb[1].mxu0 }
 0x105   :  { %v114_v10 = vpop.f32.mrb[2].mxu0 }
 0x106   :  { %282 = vtanh.f32 %v112_v8  ;;  %v115_v11 = vadd.f32 %v252_v6, %v114_v10  ;;  %v267_v12 = vpop.f32.mrb[3].mxu0 }
 0x108   :  { %284 = vtanh.f32 %v115_v11 }
 0x110   :  { %v283_v14 = vpop.eup %282 }
 0x111   :  { %v127_v15 = vmul.f32 %v283_v14, %v256_v13 }
 0x112   :  { %v285_v16 = vpop.eup %284 }
 0x113   :  { %129 = vadd.xlane.f32.xlu0 %v127_v15  ;;  %v128_v17 = vmul.f32 %v285_v16, %v256_v13 }
 0x117   :  { %131 = vadd.xlane.f32.xlu0 %v128_v17 }
 0x1a0   :  { %v130_v21 = vpop.xlane.xlu0 %129 }
 0x1a1   :  { %v140_v24 = vrot.slane %v130_v21, %v139_v22 }
 0x1a4   :  { %v132_v23 = vpop.xlane.xlu0 %131 }
 0x1a5   :  { %v144_v25 = vrot.slane %v132_v23, %v139_v22 }
 0x1a7   :  { %v146_v26 = vsel %vm145_vm2, %v144_v25, %v140_v24 }
 0x1a8   :  { %v149_v27 = vsel %vm148_vm3, %v146_v26, -inf }
 0x1a9   :  { %150 = vmax.xlane.f32.xlu1 %v149_v27 }
 0x236   :  { %v151_v31 = vpop.xlane.xlu1 %150 }
 0x237   :  { %v156_v32 = vrot.slane %v151_v31, %v155_v29  ;;  %v160_v33 = vrot.slane %v151_v31, %v159_v30 }
 0x239   :  { %v163_v34 = vsub.f32 %v130_v21, %v156_v32  ;;  %v164_v35 = vsub.f32 %v132_v23, %v160_v33 }
 0x23b   :  { %v165_v36 = vmul.f32 1.442695, %v163_v34  ;;  %v167_v37 = vmul.f32 1.442695, %v164_v35 }
 0x23d   :  { %286 = vpow2.f32 %v165_v36 }
 0x23e   :  { %288 = vpow2.f32 %v167_v37 }
 0x247   :  { %v287_v38 = vpop.eup %286 }
 0x248   :  { %v289_v39 = vpop.eup %288  ;;  %172 = vperm.xlu1 %278, %v287_v38  }
 0x249   :  { %175 = vperm.xlu0 %279, %v289_v39  }
 0x2c7   :  { %v173_v40 = vpop.permute.xlu1 %172 }
 0x2c8   :  { %v176_v41 = vpop.permute.xlu0 %175  ;;  %v180_v42 = vrot.slane %v173_v40, %v139_v22 }
 0x2c9   :  { %v184_v43 = vrot.slane %v176_v41, %v139_v22 }
 0x2cb   :  { %v185_v44 = vsel %vm145_vm2, %v184_v43, %v180_v42 }
 0x2cc   :  { %v187_v45 = vsel %vm148_vm3, %v185_v44, 0.0 }
 0x2cd   :  { %188 = vadd.xlane.f32.xlu1 %v187_v45 }
 0x35a   :  { %v189_v46 = vpop.xlane.xlu1 %188 }
 0x35b   :  { %290 = vrcp.f32 %v189_v46 }
 0x365   :  { %v291_v47 = vpop.eup %290 }
 0x366   :  { %v195_v48 = vrot.slane %v291_v47, %v155_v29  ;;  %v199_v50 = vrot.slane %v291_v47, %v159_v30 }
 0x368   :  { %v202_v49 = vmul.f32 %v287_v38, %v195_v48  ;;  %v203_v51 = vmul.f32 %v289_v39, %v199_v50 }
 0x36a   :  { %206 = vperm.xlu0 %279, %v202_v49  }
 0x36e   :  { %211 = vperm.xlu0 %279, %v203_v51  }
 0x3e9   :  { %v207_v52 = vpop.permute.xlu0 %206 }
 0x3ea   :  { %v214_v53 = vmul.f32 %v207_v52, %v423_v3 }
 0x3ec   :  { %v216_v54 = vsel %vm73_vm1, %v214_v53, 0.0 }
 0x3ed   :  { %v217_v55 = vrot.slane %v216_v54, 4  ;;  %v212_v56 = vpop.permute.xlu0 %211 }
 0x3ee   :  { %v215_v57 = vmul.f32 %v212_v56, %v425_v4 }
 0x3ef   :  { %v218_v58 = vadd.f32 %v217_v55, %v216_v54 }
 0x3f0   :  { %v223_v59 = vsel %vm73_vm1, %v215_v57, 0.0 }
 0x3f1   :  { %v219_v60 = vrot.slane %v218_v58, 2  ;;  %v224_v61 = vrot.slane %v223_v59, 4 }
 0x3f3   :  { %v220_v62 = vadd.f32 %v219_v60, %v218_v58  ;;  %v225_v63 = vadd.f32 %v224_v61, %v223_v59 }
 0x3f5   :  { %v226_v0 = vrot.slane %v225_v63, 2  ;;  %v221_v1 = vrot.slane %v220_v62, 1 }
 0x3f7   :  { %v227_v2 = vadd.f32 %v226_v0, %v225_v63  ;;  %v222_v3 = vadd.f32 %v221_v1, %v220_v62 }
 0x3f9   :  { %v228_v5 = vrot.slane %v227_v2, 1 }
 0x3fb   :  { %v229_v6 = vadd.f32 %v228_v5, %v227_v2 }
 0x3fd   :  { %v232_v7 = vsel %vm145_vm2, %v229_v6, %v222_v3 }
 0x3fe   :  { %235 = vst.msk [vmem:[#allocation7] sm:$0x3] %vm234_vm4, %v232_v7 }
 0x3ff   :  { %347 = shalt.err (!%p344_p6)
}
 0x400   :  { %s348_s22 = scalar_lea.hbm %s461_s4, 32 }
 0x401   :  { %p349_p7 = scmp.ne.s32.totalorder %s461_s4, %s348_s22  ;;  %p352_p8 = scmp.lt.u32.totalorder %s348_s22, %s461_s4 }
 0x403   :  { %p354_p9 = pnand %p352_p8, %p349_p7 }
 0x405   :  { %357 = shalt.err (!%p354_p9)
}
 0x406   :  { %245 = dma.vmem_to_hbm [thread:$0]  %s243_s3, 32, %s461_s4, [#allocation4]  }
 0x407   :  { %362 = dma.done.wait [#allocation4], 32  }
 0x408   :  { %363 = vsyncadd [#allocation4], 4294967264 }
 0x409   :  { %249 = vsyncpa [#allocation3], 1 }
 0x40a   :  { %250 = vsyncpa [#allocation6], 1 }
 0x40b   :  { %251 = vsyncpa [#allocation4], 1 }

</bundles_post_ra>
